<compile_context>
chip_gen: v7x
topology: tpu7x:2x2x1
jax: 0.10.0
libtpu: 0.0.40
codegen_flags: <defaults>
</compile_context>

<pallas_src>
import functools

import numpy as np
import jax
import jax.numpy as jnp
from jax import lax
from jax.experimental import pallas as pl
from jax.experimental.pallas import tpu as pltpu


def _rope_kernel(cos_ref, sin_ref, q_ref, k_ref, qo_ref, ko_ref, *,
                 head_dim, shift_lo, shift_hi):
    """RoPE on lane-flattened (tT, HDp) tiles.

    cos_ref: (tT, HDp) f32 cos table (tiled over heads, 0 in padded lanes).
    sin_ref: (tT, HDp) f32 sign-folded sin table: -sin on the first half of
             each head, +sin on the second half, 0 in padded lanes.
    """
    cos = cos_ref[...]
    sin = sin_ref[...]
    q = q_ref[...].astype(jnp.float32)
    k = k_ref[...].astype(jnp.float32)

    ax = q.ndim - 1
    # Hoisted once per tile, shared by q and k.
    lane = lax.broadcasted_iota(jnp.int32, q.shape, ax)
    if head_dim & (head_dim - 1) == 0:          # power-of-two fast path
        lane_in_head = lane & (head_dim - 1)
    else:
        lane_in_head = lane % head_dim
    is_lo = lane_in_head < (head_dim // 2)

    def rope(x):
        # first half of each head needs x[j + half], second half x[j - half];
        # both rolls stay within the head for the lanes they are selected on.
        rot = jnp.where(is_lo,
                        pltpu.roll(x, shift_lo, ax),   # x[j + half]
                        pltpu.roll(x, shift_hi, ax))   # x[j - half]
        return x * cos + rot * sin

    qo_ref[...] = rope(q).astype(qo_ref.dtype)
    ko_ref[...] = rope(k).astype(ko_ref.dtype)


def _round_up(x, m):
    return ((x + m - 1) // m) * m


def _vmem_capacity_bytes():
    try:
        return int(pltpu.get_tpu_info().vmem_capacity_bytes)
    except Exception:
        return 64 * 1024 * 1024   # conservative default (v7x per-core VMEM)


def _plan_tiles(B, T, HDp, qk_itemsize):
    """Pick the seq tile tT, padded T, and a VMEM limit (dtype + gen aware)."""
    cap = _vmem_capacity_bytes()
    # ~3/8 of physical VMEM as the live-block budget:
    #   128 MiB parts (v5e/v6e) -> 48 MiB; 64 MiB parts (v7x) -> 24 MiB.
    budget = min((cap * 3) // 8, 48 * 1024 * 1024)

    # Live bytes per sequence row: q, k, q_out, k_out double-buffered at the
    # real input itemsize + the two f32 table blocks double-buffered.
    bytes_per_row = 2 * HDp * (4 * qk_itemsize + 2 * 4)
    tile_max = max(8, min(4096, (budget // bytes_per_row) // 8 * 8))

    if T <= tile_max:
        tT = _round_up(T, 8)
    else:
        tT = tile_max
    # Make sure the grid can split across v7x's two TensorCores when B == 1.
    if B == 1 and T > 8 and tT >= T:
        tT = _round_up(-(-T // 2), 8)

    T_pad = _round_up(T, tT)
    live = tT * bytes_per_row
    vmem_limit = min(max(int(live * 1.5) + (4 << 20), 16 << 20), (cap * 3) // 4)
    return tT, T_pad, vmem_limit


def rotary_position_embedding(q, k):
    """Applies RoPE to q and k. q, k: (B, T, H, D). Returns (q_rot, k_rot)."""
    B, T, H, D = q.shape
    assert k.shape == (B, T, H, D), "q and k must share a (B, T, H, D) shape"
    assert D % 2 == 0, "head dim must be even for RoPE"
    half = D // 2
    HD = H * D
    HDp = _round_up(HD, 128)           # lane-dense (unmasked) loads/stores

    tT, T_pad, vmem_limit = _plan_tiles(B, T, HDp, q.dtype.itemsize)
    num_t = T_pad // tT

    # ---- sin/cos table setup (plain JAX glue; matches the torch module) ----
    inv_freq = 1.0 / (10000.0 ** (jnp.arange(0, D, 2, dtype=jnp.float32) / D))
    pos = jnp.arange(T_pad, dtype=jnp.float32)
    freqs = pos[:, None] * inv_freq[None, :]             # (T_pad, D//2)
    emb = jnp.concatenate([freqs, freqs], axis=-1)       # (T_pad, D)
    sin = jnp.sin(emb)
    cos = jnp.cos(emb)
    # Fold the rotate_half sign into a single sin table.
    sin_signed = jnp.where(jnp.arange(D) < half, -sin, sin)

    cos_f = jnp.tile(cos, (1, H)).astype(jnp.float32)         # (T_pad, H*D)
    sin_f = jnp.tile(sin_signed, (1, H)).astype(jnp.float32)  # (T_pad, H*D)
    if HDp != HD:
        lane_pad = ((0, 0), (0, HDp - HD))
        cos_f = jnp.pad(cos_f, lane_pad)        # zeros kill padded lanes
        sin_f = jnp.pad(sin_f, lane_pad)

    # ---- lane-dense activations (contiguous reshape: no data movement) ----
    q2 = q.reshape(B, T, HD)
    k2 = k.reshape(B, T, HD)
    if T_pad != T or HDp != HD:
        pad = ((0, 0), (0, T_pad - T), (0, HDp - HD))
        q2 = jnp.pad(q2, pad)
        k2 = jnp.pad(k2, pad)

    tbl_spec = pl.BlockSpec((tT, HDp), lambda t, b: (t, 0))
    qk_spec = pl.BlockSpec((pl.Squeezed(), tT, HDp), lambda t, b: (b, t, 0))

    kernel = functools.partial(
        _rope_kernel,
        head_dim=D,
        shift_lo=HDp - half,   # roll by -half  -> x[j + half]
        shift_hi=half,         # roll by +half  -> x[j - half]
    )

    out_shape = (
        jax.ShapeDtypeStruct((B, T_pad, HDp), q.dtype),
        jax.ShapeDtypeStruct((B, T_pad, HDp), k.dtype),
    )

    q_rot, k_rot = pl.pallas_call(
        kernel,
        out_shape=out_shape,
        grid_spec=pltpu.PrefetchScalarGridSpec(
            num_scalar_prefetch=0,
            # t outer, b inner: the table block index is constant across b, so
            # each table block is fetched once per seq tile and reused for all B.
            grid=(num_t, B),
            in_specs=[tbl_spec, tbl_spec, qk_spec, qk_spec],
            out_specs=[qk_spec, qk_spec],
        ),
        compiler_params=pltpu.CompilerParams(
            dimension_semantics=("parallel", "parallel"),
            vmem_limit_bytes=vmem_limit,
        ),
    )(cos_f, sin_f, q2, k2)

    if T_pad != T or HDp != HD:
        q_rot = q_rot[:, :T, :HD]
        k_rot = k_rot[:, :T, :HD]
    return q_rot.reshape(B, T, H, D), k_rot.reshape(B, T, H, D)


# ----------------------------- reference ----------------------------------
def _rotate_half(x):
    h = x.shape[-1] // 2
    return jnp.concatenate([-x[..., h:], x[..., :h]], axis=-1)


def _reference(q, k):
    """Pure-JAX reference mirroring the PyTorch module exactly."""
    B, T, H, D = q.shape
    inv_freq = 1.0 / (10000.0 ** (jnp.arange(0, D, 2, dtype=jnp.float32) / D))
    pos = jnp.arange(T, dtype=jnp.float32)
    freqs = jnp.einsum("i,j->ij", pos, inv_freq)
    emb = jnp.concatenate([freqs, freqs], axis=-1)
    sin = jnp.sin(emb).reshape(1, T, 1, D)
    cos = jnp.cos(emb).reshape(1, T, 1, D)
    q_rot = q * cos + _rotate_half(q) * sin
    k_rot = k * cos + _rotate_half(k) * sin
    return q_rot, k_rot


if __name__ == "__main__":
    # batch=2, seq=8, n_head=4, head_dim=32  (H*D = 128 -> lane-dense)
    B, T, H, D = 2, 8, 4, 32
    key = jax.random.PRNGKey(0)
    kq, kk = jax.random.split(key)
    q = jax.random.normal(kq, (B, T, H, D), dtype=jnp.float32)
    k = jax.random.normal(kk, (B, T, H, D), dtype=jnp.float32)

    q_rot, k_rot = rotary_position_embedding(q, k)
    jax.block_until_ready((q_rot, k_rot))

    q_ref, k_ref = _reference(q, k)
    assert np.allclose(np.asarray(q_rot), np.asarray(q_ref), atol=1e-5, rtol=1e-5)
    assert np.allclose(np.asarray(k_rot), np.asarray(k_ref), atol=1e-5, rtol=1e-5)

    print("KERNEL_OK")
</pallas_src>

<mosaic_0001>
module attributes {stable_mosaic.version = 11 : i64} {
  func.func @_rope_kernel(%arg0: i32, %arg1: i32, %arg2: memref<8x128xf32, #tpu.memory_space<vmem>>, %arg3: memref<8x128xf32, #tpu.memory_space<vmem>>, %arg4: memref<1x8x128xf32, #tpu.memory_space<vmem>>, %arg5: memref<1x8x128xf32, #tpu.memory_space<vmem>>, %arg6: memref<1x8x128xf32, #tpu.memory_space<vmem>>, %arg7: memref<1x8x128xf32, #tpu.memory_space<vmem>>) attributes {dimension_semantics = [#tpu.dimension_semantics<parallel>, #tpu.dimension_semantics<parallel>], iteration_bounds = array<i64: 1, 2>, scalar_prefetch = 0 : i64, scratch_operands = 0 : i64, tpu.core_type = #tpu.core_type<tc>, window_params = [{transform_indices = @transform_0, window_bounds = array<i64: 8, 128>}, {transform_indices = @transform_1, window_bounds = array<i64: 8, 128>}, {transform_indices = @transform_2, window_bounds = array<i64: 1, 8, 128>}, {transform_indices = @transform_3, window_bounds = array<i64: 1, 8, 128>}, {transform_indices = @transform_4, window_bounds = array<i64: 1, 8, 128>}, {transform_indices = @transform_5, window_bounds = array<i64: 1, 8, 128>}]} {
    %c0 = arith.constant 0 : index
    %c0_0 = arith.constant 0 : index
    %0 = vector.load %arg2[%c0, %c0_0] : memref<8x128xf32, #tpu.memory_space<vmem>>, vector<8x128xf32>
    %c0_1 = arith.constant 0 : index
    %c0_2 = arith.constant 0 : index
    %1 = vector.load %arg3[%c0_1, %c0_2] : memref<8x128xf32, #tpu.memory_space<vmem>>, vector<8x128xf32>
    %c0_3 = arith.constant 0 : index
    %c0_4 = arith.constant 0 : index
    %c0_5 = arith.constant 0 : index
    %2 = vector.load %arg4[%c0_3, %c0_4, %c0_5] : memref<1x8x128xf32, #tpu.memory_space<vmem>>, vector<1x8x128xf32>
    %3 = vector.shape_cast %2 : vector<1x8x128xf32> to vector<8x128xf32>
    %c0_6 = arith.constant 0 : index
    %c0_7 = arith.constant 0 : index
    %c0_8 = arith.constant 0 : index
    %4 = vector.load %arg5[%c0_6, %c0_7, %c0_8] : memref<1x8x128xf32, #tpu.memory_space<vmem>>, vector<1x8x128xf32>
    %5 = vector.shape_cast %4 : vector<1x8x128xf32> to vector<8x128xf32>
    %6 = tpu.iota {dimensions = array<i32: 1>} : vector<8x128xi32>
    %c31_i32 = arith.constant 31 : i32
    %7 = vector.broadcast %c31_i32 : i32 to vector<8x128xi32>
    %8 = arith.andi %6, %7 : vector<8x128xi32>
    %c16_i32 = arith.constant 16 : i32
    %9 = vector.broadcast %c16_i32 : i32 to vector<8x128xi32>
    %10 = arith.cmpi slt, %8, %9 : vector<8x128xi32>
    %c112_i32 = arith.constant 112 : i32
    %11 = tpu.dynamic_rotate %3 by %c112_i32 dim 1 : vector<8x128xf32>, i32 -> vector<8x128xf32>
    %c16_i32_9 = arith.constant 16 : i32
    %12 = tpu.dynamic_rotate %3 by %c16_i32_9 dim 1 : vector<8x128xf32>, i32 -> vector<8x128xf32>
    %13 = arith.select %10, %11, %12 : vector<8x128xi1>, vector<8x128xf32>
    %14 = arith.mulf %3, %0 : vector<8x128xf32>
    %15 = arith.mulf %13, %1 : vector<8x128xf32>
    %16 = arith.addf %14, %15 : vector<8x128xf32>
    %c0_10 = arith.constant 0 : index
    %c0_11 = arith.constant 0 : index
    %c0_12 = arith.constant 0 : index
    %17 = vector.load %arg6[%c0_10, %c0_11, %c0_12] : memref<1x8x128xf32, #tpu.memory_space<vmem>>, vector<1x8x128xf32>
    %18 = vector.shape_cast %17 : vector<1x8x128xf32> to vector<8x128xf32>
    %19 = vector.shape_cast %16 : vector<8x128xf32> to vector<1x8x128xf32>
    tpu.vector_store %arg6[%c0_10, %c0_11, %c0_12], %19 {strides = array<i32>} : memref<1x8x128xf32, #tpu.memory_space<vmem>>, vector<1x8x128xf32>,
    %c112_i32_13 = arith.constant 112 : i32
    %20 = tpu.dynamic_rotate %5 by %c112_i32_13 dim 1 : vector<8x128xf32>, i32 -> vector<8x128xf32>
    %c16_i32_14 = arith.constant 16 : i32
    %21 = tpu.dynamic_rotate %5 by %c16_i32_14 dim 1 : vector<8x128xf32>, i32 -> vector<8x128xf32>
    %22 = arith.select %10, %20, %21 : vector<8x128xi1>, vector<8x128xf32>
    %23 = arith.mulf %5, %0 : vector<8x128xf32>
    %24 = arith.mulf %22, %1 : vector<8x128xf32>
    %25 = arith.addf %23, %24 : vector<8x128xf32>
    %c0_15 = arith.constant 0 : index
    %c0_16 = arith.constant 0 : index
    %c0_17 = arith.constant 0 : index
    %26 = vector.load %arg7[%c0_15, %c0_16, %c0_17] : memref<1x8x128xf32, #tpu.memory_space<vmem>>, vector<1x8x128xf32>
    %27 = vector.shape_cast %26 : vector<1x8x128xf32> to vector<8x128xf32>
    %28 = vector.shape_cast %25 : vector<8x128xf32> to vector<1x8x128xf32>
    tpu.vector_store %arg7[%c0_15, %c0_16, %c0_17], %28 {strides = array<i32>} : memref<1x8x128xf32, #tpu.memory_space<vmem>>, vector<1x8x128xf32>,
    return
  }
  func.func @transform_0(%arg0: i32, %arg1: i32) -> (i32, i32) {
    %c0_i32 = arith.constant 0 : i32
    %c0_i32_0 = arith.constant 0 : i32
    return %arg0, %c0_i32 : i32, i32
  }
  func.func @transform_1(%arg0: i32, %arg1: i32) -> (i32, i32) {
    %c0_i32 = arith.constant 0 : i32
    %c0_i32_0 = arith.constant 0 : i32
    return %arg0, %c0_i32 : i32, i32
  }
  func.func @transform_2(%arg0: i32, %arg1: i32) -> (i32, i32, i32) {
    %c0_i32 = arith.constant 0 : i32
    %c0_i32_0 = arith.constant 0 : i32
    return %arg1, %arg0, %c0_i32 : i32, i32, i32
  }
  func.func @transform_3(%arg0: i32, %arg1: i32) -> (i32, i32, i32) {
    %c0_i32 = arith.constant 0 : i32
    %c0_i32_0 = arith.constant 0 : i32
    return %arg1, %arg0, %c0_i32 : i32, i32, i32
  }
  func.func @transform_4(%arg0: i32, %arg1: i32) -> (i32, i32, i32) {
    %c0_i32 = arith.constant 0 : i32
    %c0_i32_0 = arith.constant 0 : i32
    return %arg1, %arg0, %c0_i32 : i32, i32, i32
  }
  func.func @transform_5(%arg0: i32, %arg1: i32) -> (i32, i32, i32) {
    %c0_i32 = arith.constant 0 : i32
    %c0_i32_0 = arith.constant 0 : i32
    return %arg1, %arg0, %c0_i32 : i32, i32, i32
  }
}

</mosaic_0001>

<bundles_post_ra>
// kernel: tpu_custom_call.1
= control target key start
LH: loop header
LB: loop body
LE: loop exit
PB: predicated region body
PF: predicated region fallthrough
CT: control target
= control target key end

     0   :  { %s1274_s0 = inlined_call_operand.hbm [shape: f32[8,128], index: 0, kind: input, shape index: {}]   ;;  %s1275_s1 = inlined_call_operand.hbm [shape: f32[8,128], index: 1, kind: input, shape index: {}]   ;;  %s1276_s2 = inlined_call_operand.hbm [shape: f32[2,8,128], index: 2, kind: input, shape index: {}]   ;;  %s1277_s3 = inlined_call_operand.hbm [shape: f32[2,8,128], index: 3, kind: input, shape index: {}]   ;;  %s1278_s4 = inlined_call_operand.hbm [shape: f32[2,8,128], index: 4, kind: output, shape index: {0}]   ;;  %s1279_s5 = inlined_call_operand.hbm [shape: f32[2,8,128], index: 5, kind: output, shape index: {1}]  }
   0x1   :  { %1290 = sst [smem:[#allocation19_spill]] %s1274_s0 }
   0x2   :  { %11 = vsyncpa [#allocation3], 0 }
   0x3   :  { %12 = vsyncpa [#allocation6], 0 }
   0x4   :  { %13 = vsyncpa [#allocation4], 0 }
   0x5   :  { %15 = vsyncpa [#allocation4 + $0x1], 0 }
   0x6   :  { %16 = vsyncpa [#allocation11], 0 }
   0x7   :  { %18 = vsyncpa [#allocation11 + $0x1], 0  ;;  %s957_s18 = smov 0   ;;  %s959_s19 = smov 0  }
   0x8   :  { %s961_s20 = smov 0   ;;  %s963_s21 = smov 0  }
   0x9   :  { %s965_s22 = smov 0   ;;  %s967_s23 = smov 0  }
   0xa LB: > { %s988_s24 = sadd.s32 4294967295, %s917_s23   ;;  %s562_s25 = sadd.s32 4294967294, %s917_s23   ;;  %s917_s23 = sphi %s967_s23, %s24_s23   ;;  %s913_s22 = sphi %s965_s22, %s1324_s22   ;;  %s909_s21 = sphi %s963_s21, %s1323_s21   ;;  %s905_s20 = sphi %s961_s20, %s1322_s20   ;;  %s901_s19 = sphi %s959_s19, %s1321_s19   ;;  %s897_s18 = sphi %s957_s18, %s1320_s18  }
   0xb   : > { %p110_p0 = scmp.ne.s32.totalorder %s901_s19, %s897_s18  ;;  %p1280_p1 = scmp.eq.s32.totalorder %s988_s24, 0 }
   0xc   : > { %p170_p3 = scmp.eq.s32.totalorder %s562_s25, 1  ;;  %p563_p5 = scmp.ge.s32.totalorder %s917_s23, 1 }
   0xd   : > { %p997_p4 = por %p1280_p1, %p110_p0  ;;  %p205_p7 = scmp.lt.s32.totalorder %s917_s23, 3 }
   0xe   : > { %p1002_p6 = por %p170_p3, %p110_p0  ;;  %s919_s29 = smov [#allocation2]  }
   0xf   : > { %s1291_s26 = scalar_select %p997_p4, 1, 0 }
  0x10   : > { %s1292_s27 = scalar_select %p1002_p6, 1, 0 }
  0x11   : > { %p1007_p8 = pnand %p563_p5, %p205_p7  ;;  %s220_s30 = sshll.u32 %s919_s29, 4  ;;  %s221_s30 = int_to_ptr.vmem [resolvable:$true] %s220_s30 }
  0x12   : > { %s33_s7 = sadd.s32 1, %s913_s22  ;;  %s97_s8 = sadd.s32 1, %s905_s20 }
  0x13   : > { %s1293_s28 = scalar_select %p1007_p8, 1, 0 }
  0x14   : > { %p600_p10 = pneg %p1007_p8  ;;  %p1022_p12 = scmp.ge.s32.totalorder %s33_s7, 2 }
  0x15   : > { %s1296_s0 = sld [smem:[#allocation19_spill]] }
  0x16   : > { %p1016_p11 = pnand %p600_p10, %p1280_p1 }
  0x17   : > { %s1295_s9 = scalar_select %p1022_p12, 1, 0 }
  0x18   : > { %p1285_p0 = pneg %p1016_p11 }
  0x1b   : > { %s679_s12 = scalar_lea.hbm %s1296_s0, 128 }
  0x1c   : > { %p680_p13 = scmp.ne.s32.totalorder %s1296_s0, %s679_s12  ;;  %p686_p7 = scmp.lt.u32.totalorder %s679_s12, %s1296_s0 }
  0x1e   : > { %p682_p3 = pnand %p1285_p0, %p680_p13 }
  0x20   : > { %p683_p5 = pneg %p682_p3 }
  0x22   : > { %p688_p10 = pnand %p686_p7, %p683_p5 }
  0x24   : > { %691 = shalt.err (!%p688_p10)
}
  0x25   : > { %s692_s17 = scalar_lea.vmem %s221_s30, 128  ;;  %p700_p6 = scmp.lt.s32.totalorder %s221_s30, %s221_s30 }
  0x26   : > { %p693_p9 = scmp.ne.s32.totalorder %s221_s30, %s692_s17  ;;  %p701_p4 = scmp.lt.s32.totalorder %s692_s17, %s692_s17 }
  0x28   : > { %p695_p1 = pnand %p693_p9, %p1285_p0  ;;  %p702_p8 = por %p701_p4, %p700_p6 }
  0x2a   : > { %p696_p2 = pneg %p695_p1 }
  0x2c   : > { %p703_p12 = pnand %p702_p8, %p696_p2 }
  0x2e   : > { %706 = shalt.err (!%p703_p12)
}
  0x2f   : > { %603 = dma.hbm_to_vmem [thread:$0]  (!%p1016_p11), %s1296_s0, 128, %s221_s30, [#allocation3]  }
  0x30   : > { %p1297_p1 = scmp.ne.s32.totalorder %s1295_s9, 0  ;;  %p104_p2 = scmp.ne.s32.totalorder %s905_s20, %s901_s19 }
  0x31   : > { %p105_p4 = scmp.eq.s32.totalorder %s917_s23, 0  ;;  %p623_p6 = scmp.lt.s32.totalorder %s917_s23, 2 }
  0x32   : > { %s1326_s7 = smov (%p1297_p1, %s33_s7), 0  ;;  %p1299_p12 = scmp.eq.s32.totalorder %s988_s24, 1 }
  0x33   : > { %1298 = sst [smem:[#allocation17_spill]] %s1326_s7  ;;  %s92_s10 = ssub.s32 %s913_s22, %s1326_s7 }
  0x34   : > { %p95_p8 = scmp.eq.s32.totalorder %s92_s10, 0  ;;  %p106_p9 = por %p105_p4, %p104_p2 }
  0x35   : > { %p1060_p13 = por %p1299_p12, %p104_p2  ;;  %s244_s12 = sand.u32 1, %s917_s23  }
  0x36   : > { %s1068_s13 = scalar_select %p95_p8, %s905_s20, %s97_s8  }
  0x37   : > { %s1300_s11 = scalar_select %p1060_p13, 1, 0 }
  0x38   : > { %1301 = sst [smem:[#allocation18_spill]] %s1068_s13  ;;  %s246_s30 = sand.u32 1, %s905_s20  }
  0x39   : > { %s1071_s9 = sshll.u32 %s246_s30, 3  ;;  %s1283_s14 = sshll.u32 %s913_s22, 7 }
  0x3a   : > { %s1079_s17 = scalar_lea.hbm %s1276_s2, %s1283_s14  ;;  %s248_s25 = scalar_lea.vmem [#allocation7], %s1071_s9 }
  0x3b   : > { %s256_s29 = sshll.u32 %s248_s25, 4  ;;  %p1082_p3 = pnand %p623_p6, %p106_p9  ;;  %s1086_s29 = int_to_ptr.vmem [resolvable:$true] %s256_s29 }
  0x3c   : > { %s920_s10 = smov [#allocation5]   ;;  %s1090_s15 = scalar_lea.sflag [#allocation3], %s244_s12 }
  0x3d   : > { %s1302_s8 = scalar_select %p1082_p3, 1, 0 }
  0x3e   : > { %s1088_s30 = sshll.u32 %s920_s10, 4  ;;  %s707_s16 = scalar_lea.hbm %s1079_s17, 128  ;;  %s234_s30 = int_to_ptr.vmem [resolvable:$true] %s1088_s30 }
  0x3f   : > { %p708_p5 = scmp.ne.s32.totalorder %s1079_s17, %s707_s16  ;;  %p1287_p7 = pneg %p1082_p3 }
  0x40   : > { %s712_s0 = scalar_lea.hbm %s1276_s2, 256  ;;  %p713_p2 = scmp.lt.u32.totalorder %s1079_s17, %s1276_s2 }
  0x41   : > { %p710_p10 = pnand %p1287_p7, %p708_p5  ;;  %p714_p4 = scmp.lt.u32.totalorder %s712_s0, %s707_s16 }
  0x42   : > { %p716_p8 = scmp.lt.u32.totalorder %s707_s16, %s1079_s17 }
  0x43   : > { %p711_p1 = pneg %p710_p10  ;;  %p715_p6 = por %p714_p4, %p713_p2 }
  0x45   : > { %p717_p9 = por %p716_p8, %p715_p6 }
  0x47   : > { %p718_p12 = pnand %p717_p9, %p711_p1 }
  0x49   : > { %721 = shalt.err (!%p718_p12)
}
  0x4a   : > { %s722_s12 = scalar_lea.vmem %s1086_s29, 128  ;;  %s921_s14 = smov [#allocation7]  }
  0x4b   : > { %p723_p5 = scmp.ne.s32.totalorder %s1086_s29, %s722_s12  ;;  %s727_s10 = sshll.u32 %s921_s14, 4  ;;  %s728_s10 = int_to_ptr.vmem [resolvable:$false] %s727_s10 }
  0x4c   : > { %s729_s7 = scalar_lea.vmem %s728_s10, 256  ;;  %p730_p13 = scmp.lt.s32.totalorder %s1086_s29, %s728_s10 }
  0x4d   : > { %p725_p10 = pnand %p723_p5, %p1287_p7  ;;  %p731_p2 = scmp.lt.s32.totalorder %s729_s7, %s722_s12 }
  0x4f   : > { %p726_p0 = pneg %p725_p10  ;;  %p732_p4 = por %p731_p2, %p730_p13 }
  0x51   : > { %p733_p6 = pnand %p732_p4, %p726_p0 }
  0x53   : > { %736 = shalt.err (!%p733_p6)
}
  0x54   : > { %610 = dma.hbm_to_vmem [thread:$0]  (!%p1082_p3), %s1079_s17, 128, %s1086_s29, %s1090_s15  }
  0x55   : > { %s737_s16 = scalar_lea.hbm %s1275_s1, 128  ;;  %p1303_p0 = pneg %p1016_p11 }
  0x56   : > { %p738_p1 = scmp.ne.s32.totalorder %s1275_s1, %s737_s16  ;;  %p744_p9 = scmp.lt.u32.totalorder %s737_s16, %s1275_s1 }
  0x58   : > { %p740_p13 = pnand %p738_p1, %p1303_p0 }
  0x5a   : > { %p741_p8 = pneg %p740_p13 }
  0x5c   : > { %p746_p12 = pnand %p744_p9, %p741_p8 }
  0x5e   : > { %749 = shalt.err (!%p746_p12)
}
  0x5f   : > { %s750_s17 = scalar_lea.vmem %s234_s30, 128  ;;  %p1304_p10 = pmov %p1303_p0 }
  0x60   : > { %p751_p5 = scmp.ne.s32.totalorder %s234_s30, %s750_s17  ;;  %p758_p6 = scmp.lt.s32.totalorder %s234_s30, %s234_s30 }
  0x61   : > { %p759_p7 = scmp.lt.s32.totalorder %s750_s17, %s750_s17 }
  0x62   : > { %p753_p2 = pnand %p751_p5, %p1304_p10 }
  0x63   : > { %p760_p3 = por %p759_p7, %p758_p6 }
  0x64   : > { %p754_p4 = pneg %p753_p2 }
  0x66   : > { %p761_p0 = pnand %p760_p3, %p754_p4 }
  0x68   : > { %764 = shalt.err (!%p761_p0)
}
  0x69   : > { %606 = dma.hbm_to_vmem [thread:$0]  (!%p1016_p11), %s1275_s1, 128, %s234_s30, [#allocation6]  }
  0x6a   : > { %s1305_s0 = sshll.u32 %s913_s22, 7  ;;  %s267_s14 = scalar_lea.vmem [#allocation8], %s1071_s9 }
  0x6b   : > { %s1144_s25 = scalar_lea.hbm %s1277_s3, %s1305_s0  ;;  %s275_s12 = sshll.u32 %s267_s14, 4  ;;  %s276_s12 = int_to_ptr.vmem [resolvable:$true] %s275_s12 }
  0x6c   : > { %s765_s6 = scalar_lea.hbm %s1144_s25, 128  ;;  %p1306_p7 = scmp.ne.s32.totalorder %s1302_s8, 0 }
  0x6d   : > { %p766_p3 = scmp.ne.s32.totalorder %s1144_s25, %s765_s6  ;;  %s770_s17 = scalar_lea.hbm %s1277_s3, 256 }
  0x6e   : > { %p1307_p1 = pneg %p1306_p7  ;;  %p771_p11 = scmp.lt.u32.totalorder %s1144_s25, %s1277_s3 }
  0x6f   : > { %p772_p9 = scmp.lt.u32.totalorder %s770_s17, %s765_s6  ;;  %p774_p5 = scmp.lt.u32.totalorder %s765_s6, %s1144_s25 }
  0x70   : > { %p768_p13 = pnand %p766_p3, %p1307_p1 }
  0x71   : > { %p773_p12 = por %p772_p9, %p771_p11 }
  0x72   : > { %p769_p8 = pneg %p768_p13 }
  0x73   : > { %p775_p10 = por %p774_p5, %p773_p12 }
  0x75   : > { %p776_p2 = pnand %p775_p10, %p769_p8 }
  0x77   : > { %779 = shalt.err (!%p776_p2)
}
  0x78   : > { %s780_s9 = scalar_lea.vmem %s276_s12, 128  ;;  %p1308_p6 = pmov %p1307_p1 }
  0x79   : > { %p781_p4 = scmp.ne.s32.totalorder %s276_s12, %s780_s9  ;;  %s922_s0 = smov [#allocation8]  }
  0x7a   : > { %s785_s13 = sshll.u32 %s922_s0, 4  ;;  %s786_s13 = int_to_ptr.vmem [resolvable:$false] %s785_s13 }
  0x7b   : > { %p783_p0 = pnand %p781_p4, %p1308_p6  ;;  %s787_s16 = scalar_lea.vmem %s786_s13, 256 }
  0x7c   : > { %p788_p1 = scmp.lt.s32.totalorder %s276_s12, %s786_s13  ;;  %p789_p13 = scmp.lt.s32.totalorder %s787_s16, %s780_s9 }
  0x7d   : > { %p784_p3 = pneg %p783_p0 }
  0x7e   : > { %p790_p9 = por %p789_p13, %p788_p1 }
  0x80   : > { %p791_p11 = pnand %p790_p9, %p784_p3 }
  0x82   : > { %794 = shalt.err (!%p791_p11)
}
  0x83   : > { %613 = dma.hbm_to_vmem [thread:$0]  (!%p1306_p7), %s1144_s25, 128, %s276_s12, %s1090_s15  }
  0x84   : > { %p1309_p8 = scmp.ne.s32.totalorder %s1293_s28, 0 }
  0x85   : > { %p1310_p12 = scmp.eq.s32.totalorder (!%p1309_p8), %s988_s24, 0 }
  0x86   : > { %284 = sbr.rel (%p1309_p8) target bundleno = 314 (0x13a), region = 36 }
  0x8d   : > { %876 = dma.done.wait (%p1310_p12), [#allocation3], 128   ;;  %p1311_p5 = pmov %p1310_p12 }
  0x8f   : > { %878 = vsyncadd (%p1311_p5), [#allocation3], 4294967168  ;;  %p1312_p10 = pmov %p1311_p5 }
  0x90   : > { %p1313_p2 = pmov %p1311_p5 }
  0x91   : > { %880 = dma.done.wait (%p1312_p10), [#allocation6], 128  }
  0x92   : > { %882 = vsyncadd (%p1313_p2), [#allocation6], 4294967168  ;;  %s294_s8 = sand.u32 1, %s988_s24   ;;  %s1179_s15 = sand.u32 1, %s901_s19  }
  0x93   : > { %s1182_s28 = sshll.u32 %s1179_s15, 3  ;;  %s295_s25 = scalar_lea.sflag [#allocation3], %s294_s8 }
  0x94   : > { %s298_s14 = scalar_lea.vmem [#allocation7], %s1182_s28  ;;  %p1314_p7 = scmp.ne.s32.totalorder %s1291_s26, 0 }
  0x96   : > { %884 = dma.done.wait (%p1314_p7), %s295_s25, 256  }
  0x97   : > { %886 = vsyncadd (%p1314_p7), %s295_s25, 4294967040  ;;  %s307_s12 = scalar_lea.vmem [#allocation8], %s1182_s28  ;;  %v346_v1 = vld [vmem:[%s298_s14] sm:$0xff]  ;;  %s923_s6 = smov 112   ;;  %v348_v2 = vlaneseq  ;;  %v344_v7 = vld [vmem:[#allocation2] sm:$0xff] }
  0x98   : > { %v347_v0 = vld [vmem:[%s307_s12] sm:$0xff]  ;;  %352 = vrot.lane.b32.xlu0 %v346_v1, %s923_s6  ;;  %s924_s24 = smov 16   ;;  %v357_v10 = vmul.f32 %v346_v1, %v344_v7  ;;  %s580_s26 = sshll.u32 %s909_s21, 7 }
  0x99   : > { %361 = vrot.lane.b32.xlu1 %v347_v0, %s923_s6  ;;  %v349_v3 = vand.u32 127, %v348_v2  ;;  %v345_v8 = vld [vmem:[#allocation5] sm:$0xff]  ;;  %v366_v9 = vmul.f32 %v347_v0, %v344_v7  ;;  %s336_s30 = scalar_lea.vmem [#allocation9], %s1182_s28  ;;  %s343_s17 = scalar_lea.vmem [#allocation10], %s1182_s28 }
  0x9a   : > { %s390_s10 = sshll.u32 %s336_s30, 4  ;;  %s404_s29 = sshll.u32 %s343_s17, 4  ;;  %s1198_s10 = int_to_ptr.vmem [resolvable:$true] %s390_s10  ;;  %s1205_s29 = int_to_ptr.vmem [resolvable:$true] %s404_s29 }
  0x9b   : > { %v350_v4 = vand.u32 31, %v349_v3  ;;  %s1196_s0 = scalar_lea.hbm %s1278_s4, %s580_s26  ;;  %s1203_s16 = scalar_lea.hbm %s1279_s5, %s580_s26 }
  0x9c   : > { %354 = vrot.lane.b32.xlu0 %v346_v1, %s924_s24  ;;  %s371_s8 = scalar_lea.sflag [#allocation4], %s1179_s15  ;;  %s795_s28 = scalar_lea.vmem %s1198_s10, 128 }
  0x9d   : > { %363 = vrot.lane.b32.xlu1 %v347_v0, %s924_s24  ;;  %vm351_vm0 = vcmp.lt.s32.totalorder %v350_v4, 16  ;;  %p796_p4 = scmp.ne.s32.totalorder %s1198_s10, %s795_s28  ;;  %p1315_p6 = scmp.ne.s32.totalorder %s1300_s11, 0 }
  0x9e   : > { %s925_s25 = smov [#allocation9]  }
  0x9f   : > { %p797_p0 = pnand %p796_p4, %p1315_p6  ;;  %s799_s14 = sshll.u32 %s925_s25, 4  ;;  %s800_s14 = int_to_ptr.vmem [resolvable:$false] %s799_s14 }
  0xa0   : > { %s801_s12 = scalar_lea.vmem %s800_s14, 256  ;;  %p802_p1 = scmp.lt.s32.totalorder %s1198_s10, %s800_s14 }
  0xa1   : > { %p798_p3 = pneg %p797_p0  ;;  %p803_p13 = scmp.lt.s32.totalorder %s801_s12, %s795_s28 }
  0xa3   : > { %p804_p9 = por %p803_p13, %p802_p1 }
  0xa5   : > { %p805_p11 = pnand %p804_p9, %p798_p3 }
 0x10a   : > { %v353_v6 = vpop.permute.xlu0 %352 }
 0x10b   : > { %v362_v5 = vpop.permute.xlu1 %361 }
 0x10e   : > { %v355_v12 = vpop.permute.xlu0 %354 }
 0x10f   : > { %v364_v11 = vpop.permute.xlu1 %363  ;;  %v356_v14 = vsel %vm351_vm0, %v353_v6, %v355_v12 }
 0x110   : > { %v365_v13 = vsel %vm351_vm0, %v362_v5, %v364_v11  ;;  %v358_v16 = vmul.f32 %v356_v14, %v345_v8 }
 0x111   : > { %v367_v15 = vmul.f32 %v365_v13, %v345_v8 }
 0x112   : > { %v359_v18 = vadd.f32 %v358_v16, %v357_v10 }
 0x113   : > { %v368_v17 = vadd.f32 %v367_v15, %v366_v9 }
 0x114   : > { %360 = vst [vmem:[%s336_s30] sm:$0xff] %v359_v18 }
 0x115   : > { %369 = vst [vmem:[%s343_s17] sm:$0xff] %v368_v17 }
 0x116   : > { %808 = shalt.err (!%p805_p11)
}
 0x117   : > { %s809_s6 = scalar_lea.hbm %s1196_s0, 128  ;;  %s813_s30 = scalar_lea.hbm %s1278_s4, 256 }
 0x118   : > { %p810_p8 = scmp.ne.s32.totalorder %s1196_s0, %s809_s6  ;;  %p814_p10 = scmp.lt.u32.totalorder %s1196_s0, %s1278_s4 }
 0x119   : > { %p815_p2 = scmp.lt.u32.totalorder %s813_s30, %s809_s6  ;;  %p817_p4 = scmp.lt.u32.totalorder %s809_s6, %s1196_s0 }
 0x11a   : > { %p811_p12 = pnand %p810_p8, %p1315_p6 }
 0x11b   : > { %p816_p7 = por %p815_p2, %p814_p10 }
 0x11c   : > { %p812_p5 = pneg %p811_p12 }
 0x11d   : > { %p818_p0 = por %p817_p4, %p816_p7 }
 0x11f   : > { %p819_p3 = pnand %p818_p0, %p812_p5 }
 0x121   : > { %822 = shalt.err (!%p819_p3)
}
 0x122   : > { %596 = dma.vmem_to_hbm [thread:$0]  (%p1315_p6), %s1198_s10, 128, %s1196_s0, %s371_s8  }
 0x123   : > { %s376_s9 = scalar_lea.sflag [#allocation11], %s1179_s15  ;;  %s823_s21 = scalar_lea.vmem %s1205_s29, 128 }
 0x124   : > { %p824_p1 = scmp.ne.s32.totalorder %s1205_s29, %s823_s21  ;;  %s926_s13 = smov [#allocation10]  }
 0x125   : > { %s827_s28 = sshll.u32 %s926_s13, 4  ;;  %s828_s28 = int_to_ptr.vmem [resolvable:$false] %s827_s28 }
 0x126   : > { %p825_p13 = pnand %p824_p1, %p1315_p6  ;;  %s829_s25 = scalar_lea.vmem %s828_s28, 256 }
 0x127   : > { %p830_p11 = scmp.lt.s32.totalorder %s1205_s29, %s828_s28  ;;  %p831_p8 = scmp.lt.s32.totalorder %s829_s25, %s823_s21 }
 0x128   : > { %p826_p9 = pneg %p825_p13 }
 0x129   : > { %p832_p12 = por %p831_p8, %p830_p11 }
 0x12b   : > { %p833_p5 = pnand %p832_p12, %p826_p9 }
 0x12d   : > { %836 = shalt.err (!%p833_p5)
}
 0x12e   : > { %s837_s15 = scalar_lea.hbm %s1203_s16, 128  ;;  %s841_s8 = scalar_lea.hbm %s1279_s5, 256 }
 0x12f   : > { %p838_p10 = scmp.ne.s32.totalorder %s1203_s16, %s837_s15  ;;  %p842_p4 = scmp.lt.u32.totalorder %s1203_s16, %s1279_s5 }
 0x130   : > { %p843_p0 = scmp.lt.u32.totalorder %s841_s8, %s837_s15  ;;  %p845_p1 = scmp.lt.u32.totalorder %s837_s15, %s1203_s16 }
 0x131   : > { %p839_p2 = pnand %p838_p10, %p1315_p6 }
 0x132   : > { %p844_p3 = por %p843_p0, %p842_p4 }
 0x133   : > { %p840_p7 = pneg %p839_p2 }
 0x134   : > { %p846_p13 = por %p845_p1, %p844_p3 }
 0x136   : > { %p847_p9 = pnand %p846_p13, %p840_p7 }
 0x138   : > { %850 = shalt.err (!%p847_p9)
}
 0x139   : > { %597 = dma.vmem_to_hbm [thread:$0]  (%p1315_p6), %s1205_s29, 128, %s1203_s16, %s376_s9  }
 0x13a PF: > { %s416_s6 = sand.u32 1, %s897_s18   ;;  %p1316_p11 = scmp.ne.s32.totalorder %s1292_s27, 0 }
 0x13b   : > { %p1317_p8 = scmp.ge.s32.totalorder %s917_s23, 2  ;;  %s417_s24 = scalar_lea.sflag [#allocation4], %s416_s6 }
 0x13d   : > { %p615_p12 = pnand %p1317_p8, %p1316_p11 }
 0x13f   : > { %888 = dma.done.wait (!%p615_p12), %s417_s24, 128  }
 0x140   : > { %890 = vsyncadd (!%p615_p12), %s417_s24, 4294967168  ;;  %s426_s26 = scalar_lea.sflag [#allocation11], %s416_s6 }
 0x141   : > { %892 = dma.done.wait (!%p615_p12), %s426_s26, 128  }
 0x142   : > { %894 = vsyncadd (!%p615_p12), %s426_s26, 4294967168  ;;  %s24_s23 = sadd.s32 1, %s917_s23   ;;  %s1318_s11 = sld [smem:[#allocation18_spill]] }
 0x143   : > { %p21_p5 = scmp.ge.s32.totalorder %s24_s23, 4   ;;  %s1319_s29 = sld [smem:[#allocation17_spill]] }
 0x144   : > { %s1320_s18 = smov %s901_s19  ;;  %s1321_s19 = smov %s905_s20 }
 0x145   : > { %s1323_s21 = smov %s913_s22  ;;  %23 = sbr.rel (!%p21_p5) target bundleno = 10 (0xa), region = 118 }
 0x148   : > { %s1322_s20 = smov %s1318_s11 }
 0x149   : > { %s1324_s22 = smov %s1319_s29 }
 0x14c   :  { %431 = vsyncpa [#allocation3], 1 }
 0x14d   :  { %433 = vsyncpa [#allocation3 + $0x1], 1 }
 0x14e   :  { %434 = vsyncpa [#allocation6], 1 }
 0x14f   :  { %435 = vsyncpa [#allocation4], 1 }
 0x150   :  { %437 = vsyncpa [#allocation4 + $0x1], 1 }
 0x151   :  { %438 = vsyncpa [#allocation11], 1 }
 0x152   :  { %440 = vsyncpa [#allocation11 + $0x1], 1 }

</bundles_post_ra>
